<compile_context>
chip_gen: v7x
topology: tpu7x:2x2x1
jax: 0.10.0
libtpu: 0.0.40
codegen_flags: <defaults>
</compile_context>

<pallas_src>
import jax
import jax.numpy as jnp
from jax.experimental import pallas as pl
from jax.experimental.pallas import tpu as pltpu

_LANES = 128                      # vreg lane width — last dim of every block
_TILE_BYTES_PER_OPERAND = 2 << 20  # 2 MiB/operand tile -> 12 MiB live w/ double buffering
_SMALL_N_FALLBACK = 1 << 16        # below this, fused XLA elementwise beats a kernel launch


def _branch(alpha: float):
    """Static branch selection — mirrors the torch module's constructor-time alpha."""
    if alpha <= 0.5:
        return "square", 1.0
    elif 0.5 < alpha < 0.7:
        return "abs", 1.0
    else:  # NOTE: alpha == 0.7 lands here, same as the torch `else`.
        return "square", 5.0


def _elementwise(t, p, mode: str, coef: float):
    d = t - p
    if mode == "abs":
        return jnp.abs(d)
    out = d * d
    if coef != 1.0:
        out = out * jnp.asarray(coef, dtype=out.dtype)
    return out


def _make_kernel(mode: str, coef: float):
    def kernel(t_ref, p_ref, o_ref):
        o_ref[...] = _elementwise(t_ref[...], p_ref[...], mode, coef).astype(o_ref.dtype)
    return kernel


def _run_kernel_2d(t2d: jax.Array, p2d: jax.Array, mode: str, coef: float) -> jax.Array:
    """Run the elementwise kernel on a lane-dense (rows, 128) slab."""
    rows, lanes = t2d.shape
    itemsize = jnp.dtype(t2d.dtype).itemsize

    # Per-operand tile ~2 MiB: 4096 rows for f32, 8192 for bf16, 16384 for int8.
    # These are all multiples of the dtype's min sublane tile (8/16/32), so the
    # (8,128) constraint is satisfied; a single-block case uses the full dims.
    target_rows = max(8, _TILE_BYTES_PER_OPERAND // (lanes * itemsize))
    if rows <= target_rows:
        tn = rows                       # block == full array dims, always legal
    else:
        tn = target_rows
    grid = (pl.cdiv(rows, tn),)         # ragged last block handled by Pallas

    spec = pl.BlockSpec((tn, lanes), lambda i: (i, 0))
    n = rows * lanes
    return pl.pallas_call(
        _make_kernel(mode, coef),
        out_shape=jax.ShapeDtypeStruct((rows, lanes), t2d.dtype),
        grid=grid,
        in_specs=[spec, spec],
        out_specs=spec,
        compiler_params=pltpu.CompilerParams(
            dimension_semantics=("parallel",)),       # megacore sharding on v7x
        cost_estimate=pl.CostEstimate(
            flops=2 * n, transcendentals=0, bytes_accessed=3 * n * itemsize),
    )(t2d, p2d)


def modified_huber_loss(normed_targets: jax.Array,
                        pos_reg: jax.Array,
                        alpha: float,
                        *,
                        min_kernel_elems: int = _SMALL_N_FALLBACK) -> jax.Array:
    """Pallas TPU forward of ModifiedHuberLoss(interval=alpha)."""
    assert normed_targets.shape == pos_reg.shape
    assert normed_targets.dtype == pos_reg.dtype
    mode, coef = _branch(float(alpha))
    orig_shape = normed_targets.shape
    total = int(normed_targets.size)

    # Tiny production shapes: a fused XLA elementwise op beats any kernel launch.
    if total == 0 or total < min_kernel_elems:
        return _elementwise(normed_targets, pos_reg, mode, coef)

    t_flat = normed_targets.reshape(-1)   # reshape of contiguous array: free
    p_flat = pos_reg.reshape(-1)
    bulk = (total // _LANES) * _LANES

    if bulk == total:
        # Lane-aligned: zero wrapper-side padding/slicing.
        rows = total // _LANES
        out2d = _run_kernel_2d(t_flat.reshape(rows, _LANES),
                               p_flat.reshape(rows, _LANES), mode, coef)
        return out2d.reshape(orig_shape)

    # Misaligned: kernel on the lane-aligned bulk, fused jnp on the <128 tail.
    pieces = []
    if bulk > 0:
        rows = bulk // _LANES
        bulk_out = _run_kernel_2d(t_flat[:bulk].reshape(rows, _LANES),
                                  p_flat[:bulk].reshape(rows, _LANES), mode, coef)
        pieces.append(bulk_out.reshape(-1))
    pieces.append(_elementwise(t_flat[bulk:], p_flat[bulk:], mode, coef))
    out_flat = jnp.concatenate(pieces) if len(pieces) > 1 else pieces[0]
    return out_flat.reshape(orig_shape)


def _reference(normed_targets, pos_reg, alpha):
    mode, coef = _branch(float(alpha))
    return _elementwise(normed_targets, pos_reg, mode, coef)


if __name__ == "__main__":
    key = jax.random.PRNGKey(0)
    k1, k2, k3, k4, k5, k6 = jax.random.split(key, 6)

    # Small shapes consistent with the module (regression targets vs. predictions).
    cases = [
        # (targets, predictions)  — lane-aligned small case: batch=8, channels=16
        (jax.random.normal(k1, (8, 16), jnp.float32) * 10.0,
         jax.random.normal(k2, (8, 16), jnp.float32) * 10.0),
        # lane-aligned, a few rows: batch=64, channels=256
        (jax.random.normal(k3, (64, 256), jnp.float32),
         jax.random.normal(k4, (64, 256), jnp.float32)),
        # misaligned odd shape -> exercises bulk-kernel + jnp-tail path
        (jax.random.normal(k5, (13, 77), jnp.float32),
         jax.random.normal(k6, (13, 77), jnp.float32)),
    ]

    # Exercise all three static alpha branches through the Pallas kernel
    # (min_kernel_elems=0 forces the kernel path even at these small sizes).
    for t, p in cases:
        for alpha in (0.3, 0.6, 0.9):
            out = modified_huber_loss(t, p, alpha, min_kernel_elems=0)
            jax.block_until_ready(out)
            ref = _reference(t, p, alpha)
            assert out.shape == ref.shape and out.dtype == ref.dtype
            assert jnp.allclose(out, ref, atol=1e-5, rtol=1e-5), \
                f"mismatch shape={t.shape} alpha={alpha}"

    # Also check the default small-N jnp fallback path.
    for alpha in (0.3, 0.6, 0.9):
        t, p = cases[0]
        out = modified_huber_loss(t, p, alpha)   # default threshold -> fallback
        jax.block_until_ready(out)
        assert jnp.allclose(out, _reference(t, p, alpha), atol=1e-5, rtol=1e-5)

    print("KERNEL_OK")
</pallas_src>

<mosaic_0001>
module attributes {stable_mosaic.version = 11 : i64} {
  func.func @kernel(%arg0: i32, %arg1: memref<1x128xf32, #tpu.memory_space<vmem>>, %arg2: memref<1x128xf32, #tpu.memory_space<vmem>>, %arg3: memref<1x128xf32, #tpu.memory_space<vmem>>) attributes {dimension_semantics = [#tpu.dimension_semantics<parallel>], iteration_bounds = array<i64: 1>, scalar_prefetch = 0 : i64, scratch_operands = 0 : i64, tpu.core_type = #tpu.core_type<tc>, window_params = [{transform_indices = @transform_0, window_bounds = array<i64: 1, 128>}, {transform_indices = @transform_1, window_bounds = array<i64: 1, 128>}, {transform_indices = @transform_2, window_bounds = array<i64: 1, 128>}]} {
    %c0 = arith.constant 0 : index
    %c0_0 = arith.constant 0 : index
    %0 = vector.load %arg1[%c0, %c0_0] : memref<1x128xf32, #tpu.memory_space<vmem>>, vector<1x128xf32>
    %c0_1 = arith.constant 0 : index
    %c0_2 = arith.constant 0 : index
    %1 = vector.load %arg2[%c0_1, %c0_2] : memref<1x128xf32, #tpu.memory_space<vmem>>, vector<1x128xf32>
    %2 = arith.subf %0, %1 : vector<1x128xf32>
    %3 = arith.mulf %2, %2 : vector<1x128xf32>
    %c0_3 = arith.constant 0 : index
    %c0_4 = arith.constant 0 : index
    %4 = vector.load %arg3[%c0_3, %c0_4] : memref<1x128xf32, #tpu.memory_space<vmem>>, vector<1x128xf32>
    tpu.vector_store %arg3[%c0_3, %c0_4], %3 {strides = array<i32>} : memref<1x128xf32, #tpu.memory_space<vmem>>, vector<1x128xf32>,
    return
  }
  func.func @transform_0(%arg0: i32) -> (i32, i32) {
    %c0_i32 = arith.constant 0 : i32
    %c0_i32_0 = arith.constant 0 : i32
    return %arg0, %c0_i32 : i32, i32
  }
  func.func @transform_1(%arg0: i32) -> (i32, i32) {
    %c0_i32 = arith.constant 0 : i32
    %c0_i32_0 = arith.constant 0 : i32
    return %arg0, %c0_i32 : i32, i32
  }
  func.func @transform_2(%arg0: i32) -> (i32, i32) {
    %c0_i32 = arith.constant 0 : i32
    %c0_i32_0 = arith.constant 0 : i32
    return %arg0, %c0_i32 : i32, i32
  }
}

</mosaic_0001>

<bundles_post_ra>
// kernel: tpu_custom_call.1
= control target key start
LH: loop header
LB: loop body
LE: loop exit
PB: predicated region body
PF: predicated region fallthrough
CT: control target
= control target key end

     0   :  { %7 = vsyncpa [#allocation3], 0  ;;  %s138_s0 = inlined_call_operand.hbm [shape: f32[1,128], index: 0, kind: input, shape index: {}]   ;;  %s139_s1 = inlined_call_operand.vmem [shape: f32[1,128], index: 1, kind: input, shape index: {}]   ;;  %s140_s2 = inlined_call_operand.hbm [shape: f32[1,128], index: 2, kind: output, shape index: {}]  }
   0x1   :  { %8 = vsyncpa [#allocation4], 0  ;;  %s94_s9 = smov [#allocation2]   ;;  %s46_s13 = scalar_lea.hbm %s138_s0, 16 }
   0x2   :  { %s15_s10 = sshll.u32 %s94_s9, 4  ;;  %p47_p0 = scmp.ne.s32.totalorder %s138_s0, %s46_s13  ;;  %s16_s10 = int_to_ptr.vmem [resolvable:$true] %s15_s10 }
   0x3   :  { %p50_p1 = scmp.lt.u32.totalorder %s46_s13, %s138_s0 }
   0x5   :  { %p52_p2 = pnand %p50_p1, %p47_p0 }
   0x7   :  { %55 = shalt.err (!%p52_p2)
}
   0x8   :  { %s56_s18 = scalar_lea.vmem %s16_s10, 16  ;;  %s60_s19 = scalar_lea.vmem %s16_s10, 32 }
   0x9   :  { %p57_p3 = scmp.ne.s32.totalorder %s16_s10, %s56_s18  ;;  %p61_p4 = scmp.lt.s32.totalorder %s16_s10, %s16_s10 }
   0xa   :  { %p62_p5 = scmp.lt.s32.totalorder %s60_s19, %s56_s18 }
   0xc   :  { %p63_p6 = por %p62_p5, %p61_p4 }
   0xe   :  { %p64_p7 = pnand %p63_p6, %p57_p3 }
  0x10   :  { %67 = shalt.err (!%p64_p7)
}
  0x11   :  { %18 = dma.hbm_to_vmem [thread:$0]  %s138_s0, 16, %s16_s10, [#allocation3]  }
  0x12   :  { %90 = dma.done.wait [#allocation3], 16  }
  0x13   :  { %91 = vsyncadd [#allocation3], 4294967280  ;;  %v24_v0 = vld [vmem:[#allocation2] sm:$0x1]  ;;  %s95_s24 = smov [#allocation5]  }
  0x14   :  { %v25_v1 = vld [vmem:[%s139_s1] sm:$0x1]  ;;  %s35_s25 = sshll.u32 %s95_s24, 4  ;;  %s36_s25 = int_to_ptr.vmem [resolvable:$true] %s35_s25 }
  0x15   :  { %v26_v2 = vsub.f32 %v24_v0, %v25_v1  ;;  %s68_s26 = scalar_lea.vmem %s36_s25, 16  ;;  %s72_s27 = scalar_lea.vmem %s36_s25, 32 }
  0x16   :  { %p69_p8 = scmp.ne.s32.totalorder %s36_s25, %s68_s26  ;;  %p73_p9 = scmp.lt.s32.totalorder %s36_s25, %s36_s25 }
  0x17   :  { %v27_v3 = vmul.f32 %v26_v2, %v26_v2  ;;  %p74_p10 = scmp.lt.s32.totalorder %s72_s27, %s68_s26 }
  0x19   :  { %28 = vst [vmem:[#allocation5] sm:$0x1] %v27_v3  ;;  %p75_p11 = por %p74_p10, %p73_p9 }
  0x1b   :  { %p76_p12 = pnand %p75_p11, %p69_p8 }
  0x1d   :  { %79 = shalt.err (!%p76_p12)
}
  0x1e   :  { %s80_s29 = scalar_lea.hbm %s140_s2, 16 }
  0x1f   :  { %p81_p13 = scmp.ne.s32.totalorder %s140_s2, %s80_s29  ;;  %p84_p0 = scmp.lt.u32.totalorder %s80_s29, %s140_s2 }
  0x21   :  { %p86_p1 = pnand %p84_p0, %p81_p13 }
  0x23   :  { %89 = shalt.err (!%p86_p1)
}
  0x24   :  { %38 = dma.vmem_to_hbm [thread:$0]  %s36_s25, 16, %s140_s2, [#allocation4]  }
  0x25   :  { %92 = dma.done.wait [#allocation4], 16  }
  0x26   :  { %93 = vsyncadd [#allocation4], 4294967280 }
  0x27   :  { %42 = vsyncpa [#allocation3], 1 }
  0x28   :  { %43 = vsyncpa [#allocation4], 1 }

</bundles_post_ra>
